<compile_context>
chip_gen: v7x
topology: tpu7x:2x2x1
jax: 0.10.0
libtpu: 0.0.40
codegen_flags: <defaults>
</compile_context>

<pallas_src>
import functools

import jax
import jax.numpy as jnp
from jax.experimental import pallas as pl
from jax.experimental.pallas import tpu as pltpu

HIDDEN = 100          # from nn.Linear(s_dim, 100)
_LANE = 128
_MAX_TB = 2048        # max batch-block rows (tunable; ~2 MiB double-buffered)


def _round_up(x, m):
    return ((x + m - 1) // m) * m


def _num_tensorcores():
    """2 for v7x (megacore sharding of parallel grid axes), else 1."""
    try:
        kind = jax.devices()[0].device_kind.lower()
        if "v7" in kind:
            return 2
    except Exception:
        pass
    return 1


# ---------------------------------------------------------------------------
# Kernel: one fused forward pass for a (TB, S_PAD) block of states.
# ---------------------------------------------------------------------------
def net_kernel(s_ref, w1_ref, b1_ref, w2_ref, b2_ref, out_ref, *, a_dim):
    s = s_ref[...]                                    # (TB, S_PAD), compute dtype

    # layer 1 (actor | critic fused): h = relu(s @ W1 + b1), f32 accumulation
    h = jnp.dot(s, w1_ref[...], preferred_element_type=jnp.float32)
    h = jnp.maximum(h + b1_ref[...], 0.0)             # (TB, 2*H_PAD)

    # layer 2 (block-diagonal): cols [0:a_dim) = actor logits, col a_dim = value
    raw = jnp.dot(h.astype(w2_ref.dtype), w2_ref[...],
                  preferred_element_type=jnp.float32) + b2_ref[...]  # (TB, OUT_PAD)

    # masked softmax over the first a_dim lanes only
    col = jax.lax.broadcasted_iota(jnp.int32, raw.shape, 1)
    is_logit = col < a_dim
    logits = jnp.where(is_logit, raw, -jnp.inf)
    m = jnp.max(logits, axis=-1, keepdims=True)
    e = jnp.where(is_logit, jnp.exp(logits - m), 0.0)
    denom = jnp.sum(e, axis=-1, keepdims=True)
    r = pl.reciprocal(denom, approx=True)             # EUP slot
    r = r * (2.0 - denom * r)                         # one Newton step -> ~f32 accuracy
    probs = e * r

    # lane-dense single store: probs in cols [0:a_dim), value in col a_dim
    out_ref[...] = jnp.where(is_logit, probs, raw)


# ---------------------------------------------------------------------------
# Parameter packing (done once, outside the kernel).
# ---------------------------------------------------------------------------
def pack_params(params, dtype=jnp.bfloat16):
    """Pack the 8 nn.Linear tensors into two fused weight matrices + bias rows."""
    w1a, b1a = params["w1a"], params["b1a"].reshape(-1)
    w2a, b2a = params["w2a"], params["b2a"].reshape(-1)
    w1c, b1c = params["w1c"], params["b1c"].reshape(-1)
    w2c, b2c = params["w2c"].reshape(-1), params["b2c"].reshape(-1)

    s_dim, H = w1a.shape
    a_dim = w2a.shape[1]
    assert a_dim + 1 <= _LANE, "a_dim must fit in one 128-lane output tile"

    S_PAD = _round_up(s_dim, 16)       # 16-row aligned (bf16 sublane packing)
    H_PAD = _round_up(H, _LANE)        # 100 -> 128
    OUT_PAD = _LANE                    # lane-dense output tile

    # W1: (S_PAD, 2*H_PAD) == [ w1a | w1c ]
    W1 = jnp.zeros((S_PAD, 2 * H_PAD), jnp.float32)
    W1 = W1.at[:s_dim, :H].set(w1a)
    W1 = W1.at[:s_dim, H_PAD:H_PAD + H].set(w1c)

    # b1: (1, 2*H_PAD) == [ b1a | b1c ] (kept f32, added after the dot)
    b1 = jnp.zeros((1, 2 * H_PAD), jnp.float32)
    b1 = b1.at[0, :H].set(b1a)
    b1 = b1.at[0, H_PAD:H_PAD + H].set(b1c)

    # W2: (2*H_PAD, OUT_PAD) block-diagonal: actor logits cols, critic value col
    W2 = jnp.zeros((2 * H_PAD, OUT_PAD), jnp.float32)
    W2 = W2.at[:H, :a_dim].set(w2a)
    W2 = W2.at[H_PAD:H_PAD + H, a_dim].set(w2c)

    # b2: (1, OUT_PAD) == [ b2a, b2c, 0... ] (kept f32)
    b2 = jnp.zeros((1, OUT_PAD), jnp.float32)
    b2 = b2.at[0, :a_dim].set(b2a)
    b2 = b2.at[0, a_dim].set(b2c[0])

    return {
        "W1": W1.astype(dtype),
        "b1": b1,
        "W2": W2.astype(dtype),
        "b2": b2,
        "s_dim": s_dim,
        "a_dim": a_dim,
    }


# ---------------------------------------------------------------------------
# Wrapper.
# ---------------------------------------------------------------------------
def net_forward(s, packed, *, max_tb=_MAX_TB, min_grid_steps=None):
    """A3C Net forward. Returns (action_probs (B, a_dim), critic_value (B, 1))."""
    W1, b1, W2, b2 = packed["W1"], packed["b1"], packed["W2"], packed["b2"]
    s_dim, a_dim = packed["s_dim"], packed["a_dim"]
    S_PAD, H2 = W1.shape
    OUT_PAD = W2.shape[1]
    dtype = W1.dtype

    if min_grid_steps is None:
        min_grid_steps = _num_tensorcores()

    B = s.shape[0]
    B8 = _round_up(B, 8)
    tb = min(B8, max_tb)
    if min_grid_steps > 1:
        # keep >= min_grid_steps parallel grid steps so both v7x cores run
        tb = min(tb, max(8, _round_up(-(-B8 // min_grid_steps), 8)))
    B_pad = _round_up(B, tb)
    grid = (B_pad // tb,)

    # Minimal wrapper-side padding: batch -> B_pad, features -> S_PAD only
    # (no 128-lane augmented slab), cast once to the compute dtype.
    s_p = jnp.pad(s.astype(dtype), ((0, B_pad - B), (0, S_PAD - s_dim)))

    bpe = jnp.dtype(dtype).itemsize
    cost = pl.CostEstimate(
        flops=2 * B_pad * H2 * (S_PAD + OUT_PAD),
        transcendentals=B_pad * OUT_PAD,
        bytes_accessed=(B_pad * S_PAD + W1.size + W2.size) * bpe
        + (b1.size + b2.size + B_pad * OUT_PAD) * 4,
    )

    out = pl.pallas_call(
        functools.partial(net_kernel, a_dim=a_dim),
        out_shape=jax.ShapeDtypeStruct((B_pad, OUT_PAD), jnp.float32),
        grid=grid,
        in_specs=[
            pl.BlockSpec((tb, S_PAD), lambda i: (i, 0)),
            pl.BlockSpec(W1.shape, lambda i: (0, 0)),    # weights stay VMEM-resident
            pl.BlockSpec(b1.shape, lambda i: (0, 0)),
            pl.BlockSpec(W2.shape, lambda i: (0, 0)),
            pl.BlockSpec(b2.shape, lambda i: (0, 0)),
        ],
        out_specs=pl.BlockSpec((tb, OUT_PAD), lambda i: (i, 0)),
        compiler_params=pltpu.CompilerParams(dimension_semantics=("parallel",)),
        cost_estimate=cost,
    )(s_p, W1, b1, W2, b2)

    probs = out[:B, :a_dim]
    value = out[:B, a_dim:a_dim + 1]
    return probs, value


# ---------------------------------------------------------------------------
# Synthetic params + pure-JAX reference (unfused, f32) for verification.
# ---------------------------------------------------------------------------
def init_params(key, s_dim, a_dim):
    ks = jax.random.split(key, 8)
    s1 = 1.0 / jnp.sqrt(s_dim)
    s2 = 1.0 / jnp.sqrt(HIDDEN)
    return {
        "w1a": jax.random.uniform(ks[0], (s_dim, HIDDEN), jnp.float32, -s1, s1),
        "b1a": jax.random.uniform(ks[1], (1, HIDDEN), jnp.float32, -s1, s1),
        "w2a": jax.random.uniform(ks[2], (HIDDEN, a_dim), jnp.float32, -s2, s2),
        "b2a": jax.random.uniform(ks[3], (1, a_dim), jnp.float32, -s2, s2),
        "w1c": jax.random.uniform(ks[4], (s_dim, HIDDEN), jnp.float32, -s1, s1),
        "b1c": jax.random.uniform(ks[5], (1, HIDDEN), jnp.float32, -s1, s1),
        "w2c": jax.random.uniform(ks[6], (HIDDEN, 1), jnp.float32, -s2, s2),
        "b2c": jax.random.uniform(ks[7], (1, 1), jnp.float32, -s2, s2),
    }


def net_forward_ref(s, p):
    h_a = jnp.maximum(s @ p["w1a"] + p["b1a"], 0.0)
    probs = jax.nn.softmax(h_a @ p["w2a"] + p["b2a"], axis=-1)
    h_c = jnp.maximum(s @ p["w1c"] + p["b1c"], 0.0)
    value = h_c @ p["w2c"] + p["b2c"]
    return probs, value


if __name__ == "__main__":
    key = jax.random.PRNGKey(0)
    k_s, k_p = jax.random.split(key)

    B, s_dim, a_dim = 8, 16, 4
    s = jax.random.normal(k_s, (B, s_dim), dtype=jnp.float32)
    params = init_params(k_p, s_dim, a_dim)
    probs_ref, value_ref = net_forward_ref(s, params)

    # Default bf16 weights/state: halves weight DMA + native MXU rate.
    packed = pack_params(params, dtype=jnp.bfloat16)
    probs, value = net_forward(s, packed)
    jax.block_until_ready((probs, value))

    assert probs.shape == (B, a_dim) and value.shape == (B, 1)
    assert jnp.allclose(probs, probs_ref, atol=2e-2, rtol=2e-2)
    assert jnp.allclose(value, value_ref, atol=2e-2, rtol=2e-2)
    assert jnp.allclose(jnp.sum(probs, axis=-1), 1.0, atol=1e-4)

    # f32 path still verified at tight tolerance.
    packed_f32 = pack_params(params, dtype=jnp.float32)
    probs32, value32 = net_forward(s, packed_f32)
    jax.block_until_ready((probs32, value32))
    assert jnp.allclose(probs32, probs_ref, atol=1e-5, rtol=1e-5)
    assert jnp.allclose(value32, value_ref, atol=1e-5, rtol=1e-5)

    print("KERNEL_OK")
</pallas_src>

<mosaic_0001>
module attributes {stable_mosaic.version = 11 : i64} {
  func.func @net_kernel(%arg0: i32, %arg1: memref<8x16xbf16, #tpu.memory_space<vmem>>, %arg2: memref<16x256xbf16, #tpu.memory_space<vmem>>, %arg3: memref<1x256xf32, #tpu.memory_space<vmem>>, %arg4: memref<256x128xbf16, #tpu.memory_space<vmem>>, %arg5: memref<1x128xf32, #tpu.memory_space<vmem>>, %arg6: memref<8x128xf32, #tpu.memory_space<vmem>>) attributes {dimension_semantics = [#tpu.dimension_semantics<parallel>], iteration_bounds = array<i64: 1>, scalar_prefetch = 0 : i64, scratch_operands = 0 : i64, tpu.core_type = #tpu.core_type<tc>, window_params = [{transform_indices = @transform_0, window_bounds = array<i64: 8, 16>}, {pipeline_mode = #tpu.pipeline_mode<synchronous>, transform_indices = @transform_1, window_bounds = array<i64: 16, 256>}, {pipeline_mode = #tpu.pipeline_mode<synchronous>, transform_indices = @transform_2, window_bounds = array<i64: 1, 256>}, {pipeline_mode = #tpu.pipeline_mode<synchronous>, transform_indices = @transform_3, window_bounds = array<i64: 256, 128>}, {pipeline_mode = #tpu.pipeline_mode<synchronous>, transform_indices = @transform_4, window_bounds = array<i64: 1, 128>}, {transform_indices = @transform_5, window_bounds = array<i64: 8, 128>}]} {
    %c0 = arith.constant 0 : index
    %c0_0 = arith.constant 0 : index
    %0 = vector.load %arg1[%c0, %c0_0] : memref<8x16xbf16, #tpu.memory_space<vmem>>, vector<8x16xbf16>
    %c0_1 = arith.constant 0 : index
    %c0_2 = arith.constant 0 : index
    %1 = vector.load %arg2[%c0_1, %c0_2] : memref<16x256xbf16, #tpu.memory_space<vmem>>, vector<16x256xbf16>
    %cst = arith.constant dense<0.000000e+00> : vector<8x256xf32>
    %2 = tpu.matmul %0, %1, %cst {dimension_numbers = #tpu.dot_dimension_numbers<[1], [0], [0], [1], [0, 0, 1, 1], [], []>} : vector<8x16xbf16>, vector<16x256xbf16>, vector<8x256xf32> -> vector<8x256xf32>
    %c0_3 = arith.constant 0 : index
    %c0_4 = arith.constant 0 : index
    %3 = vector.load %arg3[%c0_3, %c0_4] : memref<1x256xf32, #tpu.memory_space<vmem>>, vector<1x256xf32>
    %4 = vector.broadcast %3 : vector<1x256xf32> to vector<8x256xf32>
    %5 = arith.addf %2, %4 : vector<8x256xf32>
    %cst_5 = arith.constant 0.000000e+00 : f32
    %6 = vector.broadcast %cst_5 : f32 to vector<8x256xf32>
    %7 = arith.maximumf %5, %6 : vector<8x256xf32>
    %8 = arith.truncf %7 : vector<8x256xf32> to vector<8x256xbf16>
    %c0_6 = arith.constant 0 : index
    %c0_7 = arith.constant 0 : index
    %9 = vector.load %arg4[%c0_6, %c0_7] : memref<256x128xbf16, #tpu.memory_space<vmem>>, vector<256x128xbf16>
    %cst_8 = arith.constant dense<0.000000e+00> : vector<8x128xf32>
    %10 = tpu.matmul %8, %9, %cst_8 {dimension_numbers = #tpu.dot_dimension_numbers<[1], [0], [0], [1], [0, 0, 1, 1], [], []>} : vector<8x256xbf16>, vector<256x128xbf16>, vector<8x128xf32> -> vector<8x128xf32>
    %c0_9 = arith.constant 0 : index
    %c0_10 = arith.constant 0 : index
    %11 = vector.load %arg5[%c0_9, %c0_10] : memref<1x128xf32, #tpu.memory_space<vmem>>, vector<1x128xf32>
    %12 = vector.broadcast %11 : vector<1x128xf32> to vector<8x128xf32>
    %13 = arith.addf %10, %12 : vector<8x128xf32>
    %14 = tpu.iota {dimensions = array<i32: 1>} : vector<8x128xi32>
    %c4_i32 = arith.constant 4 : i32
    %15 = vector.broadcast %c4_i32 : i32 to vector<8x128xi32>
    %16 = arith.cmpi slt, %14, %15 : vector<8x128xi32>
    %cst_11 = arith.constant 0xFF800000 : f32
    %17 = vector.broadcast %cst_11 : f32 to vector<8x128xf32>
    %18 = arith.select %16, %13, %17 : vector<8x128xi1>, vector<8x128xf32>
    %cst_12 = arith.constant dense<0xFF800000> : vector<8xf32>
    %19 = vector.multi_reduction <maximumf>, %18, %cst_12 [1] : vector<8x128xf32> to vector<8xf32>
    %20 = vector.shape_cast %19 : vector<8xf32> to vector<8x1xf32>
    %21 = vector.broadcast %20 : vector<8x1xf32> to vector<8x128xf32>
    %22 = arith.subf %18, %21 : vector<8x128xf32>
    %23 = math.exp %22 : vector<8x128xf32>
    %cst_13 = arith.constant 0.000000e+00 : f32
    %24 = vector.broadcast %cst_13 : f32 to vector<8x128xf32>
    %25 = arith.select %16, %23, %24 : vector<8x128xi1>, vector<8x128xf32>
    %cst_14 = arith.constant dense<0.000000e+00> : vector<8xf32>
    %26 = vector.multi_reduction <add>, %25, %cst_14 [1] : vector<8x128xf32> to vector<8xf32>
    %27 = vector.shape_cast %26 : vector<8xf32> to vector<8x1xf32>
    %28 = tpu.reciprocal %27 {approx = true} : vector<8x1xf32> -> vector<8x1xf32>
    %29 = arith.mulf %27, %28 : vector<8x1xf32>
    %cst_15 = arith.constant 2.000000e+00 : f32
    %30 = vector.broadcast %cst_15 : f32 to vector<8x1xf32>
    %31 = arith.subf %30, %29 : vector<8x1xf32>
    %32 = arith.mulf %28, %31 : vector<8x1xf32>
    %33 = vector.broadcast %32 : vector<8x1xf32> to vector<8x128xf32>
    %34 = arith.mulf %25, %33 : vector<8x128xf32>
    %35 = arith.select %16, %34, %13 : vector<8x128xi1>, vector<8x128xf32>
    %c0_16 = arith.constant 0 : index
    %c0_17 = arith.constant 0 : index
    %36 = vector.load %arg6[%c0_16, %c0_17] : memref<8x128xf32, #tpu.memory_space<vmem>>, vector<8x128xf32>
    tpu.vector_store %arg6[%c0_16, %c0_17], %35 {strides = array<i32>} : memref<8x128xf32, #tpu.memory_space<vmem>>, vector<8x128xf32>,
    return
  }
  func.func @transform_0(%arg0: i32) -> (i32, i32) {
    %c0_i32 = arith.constant 0 : i32
    %c0_i32_0 = arith.constant 0 : i32
    return %arg0, %c0_i32 : i32, i32
  }
  func.func @transform_1(%arg0: i32) -> (i32, i32) {
    %c0_i32 = arith.constant 0 : i32
    %c0_i32_0 = arith.constant 0 : i32
    %c0_i32_1 = arith.constant 0 : i32
    return %c0_i32, %c0_i32_0 : i32, i32
  }
  func.func @transform_2(%arg0: i32) -> (i32, i32) {
    %c0_i32 = arith.constant 0 : i32
    %c0_i32_0 = arith.constant 0 : i32
    %c0_i32_1 = arith.constant 0 : i32
    return %c0_i32, %c0_i32_0 : i32, i32
  }
  func.func @transform_3(%arg0: i32) -> (i32, i32) {
    %c0_i32 = arith.constant 0 : i32
    %c0_i32_0 = arith.constant 0 : i32
    %c0_i32_1 = arith.constant 0 : i32
    return %c0_i32, %c0_i32_0 : i32, i32
  }
  func.func @transform_4(%arg0: i32) -> (i32, i32) {
    %c0_i32 = arith.constant 0 : i32
    %c0_i32_0 = arith.constant 0 : i32
    %c0_i32_1 = arith.constant 0 : i32
    return %c0_i32, %c0_i32_0 : i32, i32
  }
  func.func @transform_5(%arg0: i32) -> (i32, i32) {
    %c0_i32 = arith.constant 0 : i32
    %c0_i32_0 = arith.constant 0 : i32
    return %arg0, %c0_i32 : i32, i32
  }
}

</mosaic_0001>

<bundles_post_ra>
// kernel: tpu_custom_call.1
= control target key start
LH: loop header
LB: loop body
LE: loop exit
PB: predicated region body
PF: predicated region fallthrough
CT: control target
= control target key end

     0   :  { %10 = vsyncpa [#allocation3], 0  ;;  %s609_s0 = inlined_call_operand.hbm [shape: bf16[8,16], index: 0, kind: input, shape index: {}]   ;;  %s610_s1 = inlined_call_operand.hbm [shape: bf16[16,256], index: 1, kind: input, shape index: {}]   ;;  %s611_s2 = inlined_call_operand.vmem [shape: f32[1,256], index: 2, kind: input, shape index: {}]   ;;  %s612_s3 = inlined_call_operand.hbm [shape: bf16[256,128], index: 3, kind: input, shape index: {}]   ;;  %s613_s4 = inlined_call_operand.vmem [shape: f32[1,128], index: 4, kind: input, shape index: {}]   ;;  %s614_s5 = inlined_call_operand.hbm [shape: f32[8,128], index: 5, kind: output, shape index: {}]  }
   0x1   :  { %11 = vsyncpa [#allocation6], 0 }
   0x2   :  { %12 = vsyncpa [#allocation4], 0  ;;  %s513_s18 = smov [#allocation5]   ;;  %s419_s22 = scalar_lea.hbm %s610_s1, 256 }
   0x3   :  { %s28_s19 = sshll.u32 %s513_s18, 4  ;;  %p420_p0 = scmp.ne.s32.totalorder %s610_s1, %s419_s22  ;;  %s29_s19 = int_to_ptr.vmem [resolvable:$true] %s28_s19 }
   0x4   :  { %p423_p1 = scmp.lt.u32.totalorder %s419_s22, %s610_s1 }
   0x6   :  { %p425_p2 = pnand %p423_p1, %p420_p0 }
   0x8   :  { %428 = shalt.err (!%p425_p2)
}
   0x9   :  { %s429_s27 = scalar_lea.vmem %s29_s19, 256  ;;  %p434_p4 = scmp.lt.s32.totalorder %s29_s19, %s29_s19 }
   0xa   :  { %p430_p3 = scmp.ne.s32.totalorder %s29_s19, %s429_s27  ;;  %p435_p5 = scmp.lt.s32.totalorder %s429_s27, %s429_s27 }
   0xc   :  { %p436_p6 = por %p435_p5, %p434_p4 }
   0xe   :  { %p437_p7 = pnand %p436_p6, %p430_p3 }
  0x10   :  { %440 = shalt.err (!%p437_p7)
}
  0x11   :  { %s514_s28 = smov 128   ;;  %s515_s29 = smov 8  }
  0x12   :  { %34 = dma.hbm_to_vmem [thread:$0]  %s610_s1, 256, %s29_s19, [#allocation6], %s514_s28, %s514_s28, %s515_s29  }
  0x13   :  { %s516_s7 = smov [#allocation2]   ;;  %s517_s9 = smov [#allocation7]  }
  0x14   :  { %s19_s8 = sshll.u32 %s516_s7, 4  ;;  %s42_s10 = sshll.u32 %s517_s9, 4  ;;  %s20_s8 = int_to_ptr.vmem [resolvable:$true] %s19_s8  ;;  %s43_s10 = int_to_ptr.vmem [resolvable:$true] %s42_s10 }
  0x15   :  { %s441_s13 = scalar_lea.hbm %s609_s0, 64 }
  0x16   :  { %p442_p8 = scmp.ne.s32.totalorder %s609_s0, %s441_s13  ;;  %p445_p9 = scmp.lt.u32.totalorder %s441_s13, %s609_s0 }
  0x18   :  { %p447_p10 = pnand %p445_p9, %p442_p8 }
  0x1a   :  { %450 = shalt.err (!%p447_p10)
}
  0x1b   :  { %s451_s1 = scalar_lea.vmem %s20_s8, 64  ;;  %p456_p12 = scmp.lt.s32.totalorder %s20_s8, %s20_s8 }
  0x1c   :  { %p452_p11 = scmp.ne.s32.totalorder %s20_s8, %s451_s1  ;;  %p457_p13 = scmp.lt.s32.totalorder %s451_s1, %s451_s1 }
  0x1e   :  { %p458_p0 = por %p457_p13, %p456_p12 }
  0x20   :  { %p459_p1 = pnand %p458_p0, %p452_p11 }
  0x22   :  { %462 = shalt.err (!%p459_p1)
}
  0x23   :  { %22 = dma.hbm_to_vmem [thread:$0]  %s609_s0, 64, %s20_s8, [#allocation3]  }
  0x24   :  { %s463_s22 = scalar_lea.hbm %s612_s3, 2048 }
  0x25   :  { %p464_p2 = scmp.ne.s32.totalorder %s612_s3, %s463_s22  ;;  %p467_p3 = scmp.lt.u32.totalorder %s463_s22, %s612_s3 }
  0x27   :  { %p469_p4 = pnand %p467_p3, %p464_p2 }
  0x29   :  { %472 = shalt.err (!%p469_p4)
}
  0x2a   :  { %s473_s27 = scalar_lea.vmem %s43_s10, 2048  ;;  %p478_p6 = scmp.lt.s32.totalorder %s43_s10, %s43_s10 }
  0x2b   :  { %p474_p5 = scmp.ne.s32.totalorder %s43_s10, %s473_s27  ;;  %p479_p7 = scmp.lt.s32.totalorder %s473_s27, %s473_s27 }
  0x2d   :  { %p480_p8 = por %p479_p7, %p478_p6 }
  0x2f   :  { %p481_p9 = pnand %p480_p8, %p474_p5 }
  0x31   :  { %484 = shalt.err (!%p481_p9)
}
  0x32   :  { %s518_s0 = smov 64   ;;  %s519_s28 = smov 4  }
  0x33   :  { %48 = dma.hbm_to_vmem [thread:$0]  %s612_s3, 2048, %s43_s10, [#allocation6], %s518_s0, %s518_s0, %s519_s28  }
  0x34   :  { %507 = dma.done.wait [#allocation3], 64  }
  0x35   :  { %508 = vsyncadd [#allocation3], 4294967232 }
  0x36   :  { %509 = dma.done.wait [#allocation6], 2304  }
  0x37   :  { %510 = vsyncadd [#allocation6], 4294964992  ;;  %v520_v0 = vmov 0   ;;  %v396_v1 = vld [vmem:[#allocation5 + $0x4] ss:$8 sps:$4 sm:$0xff]   ;;  %v399_v4 = vld [vmem:[#allocation7 + $0x40] sm:$0xff]   ;;  %v66_v20 = vlaneseq }
  0x38   :  { %122 = vmatprep.mubr.bf16.mxu0 %v520_v0  ;;  %v398_v2 = vld [vmem:[#allocation5] ss:$8 sps:$4 sm:$0xff]   ;;  %v61_v3 = vld [vmem:[#allocation2] sm:$0xf]  ;;  %90 = vmatprep.subr.bf16.mxu0 %v396_v1  ;;  %vm86_vm0 = vcmask 130048   ;;  %v400_v5 = vld [vmem:[#allocation7] sm:$0xff]  }
  0x39   :  { %91 = vmatpush1.bf16.msra.mxu0 %v398_v2  ;;  %365 = vmatprep.subr.bf16.mxu1 %v399_v4  ;;  %v401_v6 = vld [vmem:[#allocation7 + $0x48] sm:$0xff]   ;;  %v403_v8 = vld [vmem:[#allocation7 + $0x50] sm:$0xff]   ;;  %v405_v10 = vld [vmem:[#allocation7 + $0x58] sm:$0xff]   ;;  %v67_v21 = vshrl.u32 %v66_v20, 7  ;;  %v311_v37 = vand.u32 127, %v66_v20 }
  0x3a   :  { %366 = vmatpush3.bf16.msra.mxu1 %v400_v5  ;;  %v402_v7 = vld [vmem:[#allocation7 + $0x8] sm:$0xff]   ;;  %v404_v9 = vld [vmem:[#allocation7 + $0x10] sm:$0xff]   ;;  %v406_v11 = vld [vmem:[#allocation7 + $0x18] sm:$0xff]  }
  0x3b   :  { %367 = vmatprep.subr.bf16.mxu1 %v401_v6  ;;  %v407_v12 = vld [vmem:[#allocation7 + $0x60] sm:$0xff]   ;;  %v409_v14 = vld [vmem:[#allocation7 + $0x68] sm:$0xff]   ;;  %v411_v16 = vld [vmem:[#allocation7 + $0x70] sm:$0xff]   ;;  %v68_v22 = vsub.s32 0, %v67_v21  ;;  %v72_v24 = vsub.s32 1, %v67_v21  ;;  %vm312_vm1 = vcmp.lt.s32.totalorder %v311_v37, 4 }
  0x3c   :  { %347 = vmatmul.mubr.msk.bf16.vlgmr.msra.gmra.mrb[0].mxu0 %vm86_vm0, %v61_v3  ;;  %v408_v13 = vld [vmem:[#allocation7 + $0x20] sm:$0xff]   ;;  %v410_v15 = vld [vmem:[#allocation7 + $0x28] sm:$0xff]   ;;  %v412_v17 = vld [vmem:[#allocation7 + $0x30] sm:$0xff]  }
  0x3d   :  { %v413_v18 = vld [vmem:[#allocation7 + $0x78] sm:$0xff]   ;;  %v64_v23 = vld [vmem:[%s611_s2] sm:$0x3] }
  0x3e   :  { %368 = vmatpush3.bf16.msra.mxu1 %v402_v7  ;;  %v414_v19 = vld [vmem:[#allocation7 + $0x38] sm:$0xff]   ;;  %v69_v25 = vrot.slane %v64_v23, %v68_v22  ;;  %v73_v26 = vrot.slane %v64_v23, %v72_v24  ;;  %v348_v40 = vld [vmem:[%s613_s4] ss:$0 sm:$0xff]  ;;  %s521_s4 = smov [#allocation8]  }
  0x3f   :  { %369 = vmatprep.subr.bf16.mxu1 %v403_v8  ;;  %s335_s8 = sshll.u32 %s521_s4, 4  ;;  %s336_s8 = int_to_ptr.vmem [resolvable:$true] %s335_s8 }
  0x40   :  { %s485_s9 = scalar_lea.vmem %s336_s8, 128  ;;  %p490_p11 = scmp.lt.s32.totalorder %s336_s8, %s336_s8 }
  0x41   :  { %p486_p10 = scmp.ne.s32.totalorder %s336_s8, %s485_s9  ;;  %p491_p12 = scmp.lt.s32.totalorder %s485_s9, %s485_s9 }
  0x42   :  { %370 = vmatpush3.bf16.msra.mxu1 %v404_v9 }
  0x43   :  { %371 = vmatprep.subr.bf16.mxu1 %v405_v10  ;;  %p492_p13 = por %p491_p12, %p490_p11 }
  0x45   :  { %p493_p0 = pnand %p492_p13, %p486_p10 }
  0x46   :  { %372 = vmatpush3.bf16.msra.mxu1 %v406_v11 }
  0x47   :  { %373 = vmatprep.subr.bf16.mxu1 %v407_v12 }
  0x4a   :  { %374 = vmatpush3.bf16.msra.mxu1 %v408_v13 }
  0x4b   :  { %375 = vmatprep.subr.bf16.mxu1 %v409_v14 }
  0x4e   :  { %376 = vmatpush3.bf16.msra.mxu1 %v410_v15 }
  0x4f   :  { %377 = vmatprep.subr.bf16.mxu1 %v411_v16 }
  0x52   :  { %378 = vmatpush3.bf16.msra.mxu1 %v412_v17 }
  0x53   :  { %379 = vmatprep.subr.bf16.mxu1 %v413_v18 }
  0x56   :  { %380 = vmatpush3.bf16.msra.mxu1 %v414_v19 }
 0x10f   :  { %v124_v27 = vpop.f32.mrb[0].mxu0 }
 0x110   :  { %v125_v28 = vadd.f32 %v124_v27, %v69_v25  ;;  %v126_v29 = vpop.f32.mrb[1].mxu0 }
 0x111   :  { %v127_v30 = vadd.f32 %v126_v29, %v73_v26  ;;  %v128_v31 = vpop.f32.mrb[2].mxu0 }
 0x112   :  { %v131_v32 = vmax.f32 %v125_v28, 0.0  ;;  %v129_v33 = vpop.f32.mrb[3].mxu0 }
 0x113   :  { %v132_v34 = vmax.f32 %v127_v30, 0.0 }
 0x114   :  { %v133_v36 = vpack.c.bf16 %v131_v32, %v131_v32 }
 0x115   :  { %v134_v35 = vpack.c.bf16 %v132_v34, %v132_v34 }
 0x117   :  { %302 = vmatprep.mubr.bf16.mxu1 %v134_v35 }
 0x118   :  { %303 = vmatmul.mubr.bf16.vlgmr.msra.gmra.mrb[0].mxu1 %v133_v36 }
 0x1eb   :  { %v381_v38 = vpop.f32.mrb[0].mxu1 }
 0x1ec   :  { %v382_v39 = vpop.f32.mrb[1].mxu1 }
 0x1ed   :  { %v383_v41 = vadd.f32 %v382_v39, %v381_v38  ;;  %v384_v42 = vpop.f32.mrb[2].mxu1 }
 0x1ee   :  { %v385_v43 = vpop.f32.mrb[3].mxu1 }
 0x1ef   :  { %v305_v44 = vadd.f32 %v383_v41, %v348_v40 }
 0x1f1   :  { %v313_v45 = vsel %vm312_vm1, %v305_v44, -inf }
 0x1f2   :  { %314 = vmax.xlane.f32.xlu0 %v313_v45 }
 0x27f   :  { %v315_v46 = vpop.xlane.xlu0 %314 }
 0x280   :  { %v316_v47 = vsub.f32 %v313_v45, %v315_v46 }
 0x282   :  { %v317_v48 = vmul.f32 1.442695, %v316_v47 }
 0x284   :  { %415 = vpow2.f32 %v317_v48 }
 0x28e   :  { %v416_v49 = vpop.eup %415 }
 0x28f   :  { %v319_v50 = vsel %vm312_vm1, %v416_v49, 0.0 }
 0x290   :  { %320 = vadd.xlane.f32.xlu0 %v319_v50 }
 0x31d   :  { %v321_v51 = vpop.xlane.xlu0 %320 }
 0x31e   :  { %417 = vrcp.f32 %v321_v51 }
 0x328   :  { %v418_v52 = vpop.eup %417 }
 0x329   :  { %v323_v53 = vmul.f32 %v418_v52, %v321_v51 }
 0x32b   :  { %v324_v54 = vsub.f32 2.0, %v323_v53 }
 0x32d   :  { %v325_v55 = vmul.f32 %v418_v52, %v324_v54 }
 0x32f   :  { %v326_v56 = vmul.f32 %v325_v55, %v319_v50 }
 0x331   :  { %v327_v57 = vsel %vm312_vm1, %v326_v56, %v305_v44 }
 0x332   :  { %328 = vst [vmem:[#allocation8] sm:$0xff] %v327_v57 }
 0x333   :  { %496 = shalt.err (!%p493_p0)
}
 0x334   :  { %s497_s12 = scalar_lea.hbm %s614_s5, 128 }
 0x335   :  { %p498_p1 = scmp.ne.s32.totalorder %s614_s5, %s497_s12  ;;  %p501_p2 = scmp.lt.u32.totalorder %s497_s12, %s614_s5 }
 0x337   :  { %p503_p3 = pnand %p501_p2, %p498_p1 }
 0x339   :  { %506 = shalt.err (!%p503_p3)
}
 0x33a   :  { %338 = dma.vmem_to_hbm [thread:$0]  %s336_s8, 128, %s614_s5, [#allocation4]  }
 0x33b   :  { %511 = dma.done.wait [#allocation4], 128  }
 0x33c   :  { %512 = vsyncadd [#allocation4], 4294967168 }
 0x33d   :  { %342 = vsyncpa [#allocation3], 1 }
 0x33e   :  { %343 = vsyncpa [#allocation6], 1 }
 0x33f   :  { %344 = vsyncpa [#allocation4], 1 }

</bundles_post_ra>
